<compile_context>
chip_gen: v7x
topology: tpu7x:2x2x1
jax: 0.10.0
libtpu: 0.0.40
codegen_flags: <defaults>
</compile_context>

<pallas_src>
import functools

import jax
import jax.numpy as jnp
from jax import lax
from jax.experimental import pallas as pl
from jax.experimental.pallas import tpu as pltpu

IGNORE_INDEX = -100  # torch CrossEntropyLoss default ignore_index
NEG_INF = -1e30      # finite "minus infinity" (avoids inf-inf NaN in exp)


def _round_up(x, m):
    return ((x + m - 1) // m) * m


def _device_kind():
    try:
        return jax.devices()[0].device_kind.lower()
    except Exception:
        return ""


_KIND = _device_kind()
# v5 and older: keep smaller row tiles and f32 exp (no bf16 EUP path on v5e).
_IS_V5_OR_OLDER = any(t in _KIND for t in ("v2", "v3", "v4", "v5"))


# ----------------------------------------------------------------------------
# Kernel 1: LM head matmul + per-token cross entropy (online logsumexp)
# ----------------------------------------------------------------------------
def _lm_head_ce_kernel(h_ref, w_ref, b_ref, labels_ref, sums_ref,
                       m_ref, l_ref, g_ref, *, tn, use_bf16_exp):
    j = pl.program_id(1)

    @pl.when(j == 0)
    def _():
        m_ref[...] = jnp.full_like(m_ref, NEG_INF)
        l_ref[...] = jnp.zeros_like(l_ref)
        g_ref[...] = jnp.zeros_like(g_ref)

    # logits tile = h[tm, D] @ w[D, tn]  (bf16 operands, f32 accumulation).
    # Weight is pre-transposed so this is a standard contraction (no per-step
    # RHS relayout); padded vocab columns carry bias == NEG_INF so no extra
    # per-step vocab mask is required.
    logits = jnp.dot(h_ref[...], w_ref[...],
                     preferred_element_type=jnp.float32)          # [tm, tn]
    logits = logits + b_ref[...]                                  # + bias [1, tn]

    labels = labels_ref[...]                                      # [tm, 1] int32
    col_global = j * tn + lax.broadcasted_iota(jnp.int32, logits.shape, 1)

    # Online logsumexp across vocab tiles.
    tile_max = jnp.max(logits, axis=-1, keepdims=True)
    m_new = jnp.maximum(m_ref[...], tile_max)
    alpha = jnp.exp(m_ref[...] - m_new)
    if use_bf16_exp:
        # bf16 EUP exp (v6e/v7x), f32 row-sum accumulation.
        ex = jnp.exp((logits - m_new).astype(jnp.bfloat16))
        tile_sum = jnp.sum(ex.astype(jnp.float32), axis=-1, keepdims=True)
    else:
        tile_sum = jnp.sum(jnp.exp(logits - m_new), axis=-1, keepdims=True)
    l_ref[...] = alpha * l_ref[...] + tile_sum
    m_ref[...] = m_new

    # Gold logit lives in exactly one vocab tile; accumulate it there.
    g_ref[...] = g_ref[...] + jnp.sum(
        jnp.where(col_global == labels, logits, 0.0), axis=-1, keepdims=True)

    @pl.when(j == pl.num_programs(1) - 1)
    def _():
        valid = (labels != IGNORE_INDEX).astype(jnp.float32)       # [tm, 1]
        lse = m_ref[...] + jnp.log(l_ref[...])                     # [tm, 1]
        per_row = (lse - g_ref[...]) * valid
        lane = lax.broadcasted_iota(jnp.int32, sums_ref.shape, 2)  # (1,1,128)
        sums_ref[...] = (jnp.where(lane == 0, jnp.sum(per_row), 0.0)
                         + jnp.where(lane == 1, jnp.sum(valid), 0.0))


def prepare_lm_head(wte, bias, tn):
    """One-time prep: transpose to [D, V_pad] bf16, pad bias columns with NEG_INF."""
    V, D = wte.shape
    V_pad = _round_up(V, tn)
    w_t = wte.T                                                    # [D, V]
    if V_pad != V:
        w_t = jnp.pad(w_t, ((0, 0), (0, V_pad - V)))
    w_t_bf = w_t.astype(jnp.bfloat16)
    b = bias.reshape(1, V).astype(jnp.float32)
    if V_pad != V:
        # NEG_INF bias on padded columns -> exp() contributes exactly 0;
        # removes the per-step in-kernel vocab mask entirely.
        b = jnp.pad(b, ((0, 0), (0, V_pad - V)), constant_values=NEG_INF)
    return w_t_bf, b


def lm_head_ce_sums(hidden_flat_bf16, w_t_bf, bias_pad, labels_flat, *, tn,
                    is_v5=_IS_V5_OR_OLDER):
    """Returns (sum of per-token CE loss, number of valid tokens)."""
    BS, D = hidden_flat_bf16.shape
    V_pad = w_t_bf.shape[1]

    # tm=512 puts the streamed-weight intensity past the v6e/v7x roofline;
    # v5-class chips stay at 256 (their crossover is ~240 flops/byte).
    tm_target = 256 if is_v5 else 512
    if BS % tm_target == 0:
        tm = tm_target
    else:
        tm = min(tm_target, _round_up(BS, 8))
    BS_pad = _round_up(BS, tm)

    h = hidden_flat_bf16
    labels = labels_flat.astype(jnp.int32)
    if BS_pad != BS:
        # Fallback only for awkward BS (BS = B*S usually divides tm cleanly).
        h = jnp.pad(h, ((0, BS_pad - BS), (0, 0)))
        labels = jnp.pad(labels, (0, BS_pad - BS), constant_values=IGNORE_INDEX)
    labels_2d = labels.reshape(BS_pad, 1)

    n_rt = BS_pad // tm
    n_vt = V_pad // tn
    use_bf16_exp = not is_v5
    kernel = functools.partial(_lm_head_ce_kernel, tn=tn,
                               use_bf16_exp=use_bf16_exp)

    # Deeper pipelining on the streamed weight tile for v5 (DMA ~= compute).
    w_spec = pl.BlockSpec((D, tn), lambda i, j: (0, j))
    if is_v5:
        try:
            w_spec = pl.BlockSpec((D, tn), lambda i, j: (0, j),
                                  pipeline_mode=pl.Buffered(3))
        except TypeError:
            pass

    sums = pl.pallas_call(
        kernel,
        out_shape=jax.ShapeDtypeStruct((n_rt, 1, 128), jnp.float32),
        grid_spec=pltpu.PrefetchScalarGridSpec(
            num_scalar_prefetch=0,
            grid=(n_rt, n_vt),
            in_specs=[
                pl.BlockSpec((tm, D), lambda i, j: (i, 0)),   # hidden rows (bf16)
                w_spec,                                       # LM head [D, V_pad] bf16
                pl.BlockSpec((1, tn), lambda i, j: (0, j)),   # bias (f32, NEG_INF-padded)
                pl.BlockSpec((tm, 1), lambda i, j: (i, 0)),   # labels
            ],
            out_specs=pl.BlockSpec((1, 1, 128), lambda i, j: (i, 0, 0)),
            scratch_shapes=[pltpu.VMEM((tm, 1), jnp.float32)] * 3),
        compiler_params=pltpu.CompilerParams(
            dimension_semantics=("parallel", "arbitrary")),
    )(h, w_t_bf, bias_pad, labels_2d)

    loss_total = jnp.sum(sums[:, 0, 0])
    valid_total = jnp.sum(sums[:, 0, 1])
    return loss_total, valid_total


# ----------------------------------------------------------------------------
# Kernel 2: cosine score matrix + SimCTG contrastive loss (column-tiled)
# ----------------------------------------------------------------------------
def _cosine_cl_kernel(h_ref, ids_ref, sums_ref,
                      nh_ref, gold_ref, row_acc, cnt_acc,
                      *, margin, pad_token_id, tc):
    j = pl.program_id(1)

    @pl.when(j == 0)
    def _():
        h = h_ref[0].astype(jnp.float32)                      # [S, D]
        sumsq = jnp.sum(h * h, axis=-1, keepdims=True)
        inv = lax.rsqrt(sumsq + 1e-12)                        # EUP rsqrt; eps for zero rows
        nh_f32 = h * inv
        nh_ref[...] = nh_f32.astype(jnp.bfloat16)             # cached normalized reps
        # gold = diag(cos) via O(S*D) row-wise self-dot (no S^2 compare/select).
        gold_ref[...] = jnp.sum(nh_f32 * nh_f32, axis=-1, keepdims=True)
        row_acc[...] = jnp.zeros_like(row_acc)
        cnt_acc[...] = jnp.zeros_like(cnt_acc)

    ids = ids_ref[0]                                          # [S, 1] int32
    valid_len = jnp.sum((ids != pad_token_id).astype(jnp.int32))

    col0 = pl.multiple_of(j * tc, 8)
    nh_cols = nh_ref[pl.ds(col0, tc), :]                      # [tc, D] bf16

    # cosine block = nh @ nh_cols^T (MXU, bf16 in, f32 accumulate).
    cos = lax.dot_general(nh_ref[...], nh_cols, (((1,), (1,)), ((), ())),
                          preferred_element_type=jnp.float32)  # [S, tc]

    row = lax.broadcasted_iota(jnp.int32, cos.shape, 0)
    col = col0 + lax.broadcasted_iota(jnp.int32, cos.shape, 1)

    loss_m = jnp.maximum(margin - (gold_ref[...] - cos), 0.0)  # relu(margin - (gold - cos))
    # build_mask_matrix: (1 - eye) with rows/cols >= valid_len zeroed (prefix=0).
    loss_mask = ((row != col) & (row < valid_len) & (col < valid_len)
                 ).astype(jnp.float32)

    row_acc[...] = row_acc[...] + jnp.sum(loss_m * loss_mask, axis=-1, keepdims=True)
    cnt_acc[...] = cnt_acc[...] + jnp.sum(loss_mask, axis=-1, keepdims=True)

    @pl.when(j == pl.num_programs(1) - 1)
    def _():
        input_mask = (ids != pad_token_id).astype(jnp.float32)    # [S, 1]
        lane = lax.broadcasted_iota(jnp.int32, sums_ref.shape, 2)  # (1,1,128)
        sums_ref[...] = (jnp.where(lane == 0, jnp.sum(row_acc[...] * input_mask), 0.0)
                         + jnp.where(lane == 1, jnp.sum(cnt_acc[...]), 0.0))


def cosine_cl_loss(hidden_bf16, input_ids, margin, pad_token_id):
    """SimCTG contrastive loss; hidden is streamed in bf16, cosine math f32."""
    B, S, D = hidden_bf16.shape

    # Column tile of the S x S cosine block: bounds live VMEM to ~S*tc even at
    # long sequence lengths (v7x 64 MiB / v5e 16 MiB scoped defaults).
    tc = min(512, _round_up(S, 8))
    S_pad = _round_up(S, tc)

    h = hidden_bf16
    ids = input_ids.astype(jnp.int32)
    if S_pad != S:
        h = jnp.pad(h, ((0, 0), (0, S_pad - S), (0, 0)))
        ids = jnp.pad(ids, ((0, 0), (0, S_pad - S)), constant_values=pad_token_id)
    ids3 = ids.reshape(B, S_pad, 1)
    n_ct = S_pad // tc

    # TODO(synk): for tiny B on v7x, also tile the row axis as a "parallel"
    # grid dim so both TensorCores are fed; with B-only parallelism small
    # batches load-imbalance the megacore.
    kernel = functools.partial(_cosine_cl_kernel, margin=float(margin),
                               pad_token_id=int(pad_token_id), tc=tc)
    sums = pl.pallas_call(
        kernel,
        out_shape=jax.ShapeDtypeStruct((B, 1, 128), jnp.float32),
        grid_spec=pltpu.PrefetchScalarGridSpec(
            num_scalar_prefetch=0,
            grid=(B, n_ct),
            in_specs=[pl.BlockSpec((1, S_pad, D), lambda b, j: (b, 0, 0)),
                      pl.BlockSpec((1, S_pad, 1), lambda b, j: (b, 0, 0))],
            out_specs=pl.BlockSpec((1, 1, 128), lambda b, j: (b, 0, 0)),
            scratch_shapes=[pltpu.VMEM((S_pad, D), jnp.bfloat16),   # normalized reps
                            pltpu.VMEM((S_pad, 1), jnp.float32),    # gold diagonal
                            pltpu.VMEM((S_pad, 1), jnp.float32),    # row loss accumulator
                            pltpu.VMEM((S_pad, 1), jnp.float32)]),  # mask count accumulator
        compiler_params=pltpu.CompilerParams(
            dimension_semantics=("parallel", "arbitrary"),
            vmem_limit_bytes=48 * 1024 * 1024),
    )(h, ids3)

    loss_total = jnp.sum(sums[:, 0, 0])
    mask_total = jnp.sum(sums[:, 0, 1])
    # Guard: all-padding batch -> mask_total == 0.
    return jnp.where(mask_total > 0, loss_total / jnp.maximum(mask_total, 1.0), 0.0)


# ----------------------------------------------------------------------------
# SimCTG forward wrapper (deterministic synthetic parameters)
# ----------------------------------------------------------------------------
class SimCTGPallas:
    def __init__(self, vocab_size, embed_dim, max_seq_len, pad_token_id, key):
        k1, k2 = jax.random.split(key)
        self.vocab_size = vocab_size
        self.embed_dim = embed_dim
        self.pad_token_id = pad_token_id
        # Deterministic synthetic embeddings (LM head is weight-tied to wte).
        self.wte = 0.02 * jax.random.normal(k1, (vocab_size, embed_dim), jnp.float32)
        self.wpe = 0.01 * jax.random.normal(k2, (max_seq_len, embed_dim), jnp.float32)
        self.lm_bias = jnp.zeros((vocab_size,), jnp.float32)
        # One-time LM-head prep: cast/pad/transpose cached here instead of
        # paying a full extra HBM pass over the embedding table every forward.
        self._tn = min(512, _round_up(vocab_size, 128))
        self._lm_w_bf, self._lm_b = prepare_lm_head(self.wte, self.lm_bias, self._tn)

    def trunk(self, input_ids):
        # TODO(synk): the pretrained GPT2 transformer stack (cambridgeltl/magic_mscoco)
        # cannot be reproduced without a checkpoint; a deterministic embedding trunk
        # (token + position embeddings) stands in to produce last_hidden_states.
        _, S = input_ids.shape
        return self.wte[input_ids] + self.wpe[:S][None, :, :]

    def forward(self, input_ids, labels, margin):
        B, S = input_ids.shape
        hidden = self.trunk(input_ids)                                   # [B, S, D] f32
        hidden_bf = hidden.astype(jnp.bfloat16)                          # single cast, both kernels

        # mle_loss = CrossEntropyLoss()(logits.view(-1, V), labels.view(-1))
        # (logits never materialized in HBM; weight pre-transposed + cached bf16)
        loss_sum, valid_sum = lm_head_ce_sums(
            hidden_bf.reshape(B * S, self.embed_dim), self._lm_w_bf, self._lm_b,
            labels.reshape(B * S), tn=self._tn)
        mle_loss = jnp.where(valid_sum > 0,
                             loss_sum / jnp.maximum(valid_sum, 1.0), 0.0)

        # cl_loss = contrastive_loss(margin, cosine_scores, input_ids, pad_id)
        cl_loss = cosine_cl_loss(hidden_bf, input_ids, margin, self.pad_token_id)
        return mle_loss, cl_loss


# ----------------------------------------------------------------------------
# Pure-JAX f32 reference (for a tolerance check of the bf16 kernels)
# ----------------------------------------------------------------------------
def reference_forward(model, input_ids, labels, margin):
    hidden = model.trunk(input_ids)                                      # f32
    B, S = input_ids.shape
    V = model.vocab_size
    logits = jnp.einsum('bsd,vd->bsv', hidden, model.wte) + model.lm_bias
    lf = logits.reshape(-1, V)
    labf = labels.reshape(-1)
    valid = (labf != IGNORE_INDEX)
    lse = jax.nn.logsumexp(lf, axis=-1)
    gold = jnp.take_along_axis(lf, jnp.maximum(labf, 0)[:, None], axis=-1)[:, 0]
    ce = jnp.where(valid, lse - gold, 0.0)
    mle = jnp.sum(ce) / jnp.maximum(jnp.sum(valid.astype(jnp.float32)), 1.0)

    norm = hidden / jnp.linalg.norm(hidden, axis=-1, keepdims=True)
    cos = jnp.einsum('bsd,btd->bst', norm, norm)
    gold_d = jnp.diagonal(cos, axis1=1, axis2=2)[..., None]
    loss_m = jnp.maximum(margin - (gold_d - cos), 0.0)
    input_mask = (input_ids != model.pad_token_id).astype(jnp.float32)
    vlen = jnp.sum(input_mask, axis=-1).astype(jnp.int32)
    row = jnp.arange(S)[None, :, None]
    col = jnp.arange(S)[None, None, :]
    mask = ((row != col) & (row < vlen[:, None, None]) & (col < vlen[:, None, None])
            ).astype(jnp.float32)
    row_sum = jnp.sum(loss_m * mask, axis=-1) * input_mask
    cl = jnp.sum(row_sum) / jnp.sum(mask)
    return mle, cl


if __name__ == "__main__":
    B, S, D, V = 2, 8, 32, 128
    pad_id = V - 1

    key = jax.random.PRNGKey(0)
    kp, ki, kl = jax.random.split(key, 3)

    model = SimCTGPallas(vocab_size=V, embed_dim=D, max_seq_len=S,
                         pad_token_id=pad_id, key=kp)

    input_ids = jax.random.randint(ki, (B, S), 0, V - 1)
    input_ids = input_ids.at[1, -2:].set(pad_id)          # right-padded sequence
    labels = jax.random.randint(kl, (B, S), 0, V - 1)
    labels = labels.at[0, 0].set(IGNORE_INDEX)            # exercise ignore_index

    mle_loss, cl_loss = model.forward(input_ids, labels, margin=0.5)
    jax.block_until_ready((mle_loss, cl_loss))

    ref_mle, ref_cl = reference_forward(model, input_ids, labels, 0.5)
    assert abs(float(mle_loss) - float(ref_mle)) < 5e-2, (float(mle_loss), float(ref_mle))
    assert abs(float(cl_loss) - float(ref_cl)) < 5e-2, (float(cl_loss), float(ref_cl))
    print("KERNEL_OK")
</pallas_src>

<mosaic_0001>
module attributes {stable_mosaic.version = 11 : i64} {
  func.func @_lm_head_ce_kernel(%arg0: i32, %arg1: i32, %arg2: memref<16x32xbf16, #tpu.memory_space<vmem>>, %arg3: memref<32x128xbf16, #tpu.memory_space<vmem>>, %arg4: memref<1x128xf32, #tpu.memory_space<vmem>>, %arg5: memref<16x1xi32, #tpu.memory_space<vmem>>, %arg6: memref<1x1x128xf32, #tpu.memory_space<vmem>>, %arg7: memref<16x1xf32, #tpu.memory_space<vmem>>, %arg8: memref<16x1xf32, #tpu.memory_space<vmem>>, %arg9: memref<16x1xf32, #tpu.memory_space<vmem>>) attributes {dimension_semantics = [#tpu.dimension_semantics<parallel>, #tpu.dimension_semantics<arbitrary>], iteration_bounds = array<i64: 1, 1>, scalar_prefetch = 0 : i64, scratch_operands = 3 : i64, tpu.core_type = #tpu.core_type<tc>, window_params = [{transform_indices = @transform_0, window_bounds = array<i64: 16, 32>}, {transform_indices = @transform_1, window_bounds = array<i64: 32, 128>}, {transform_indices = @transform_2, window_bounds = array<i64: 1, 128>}, {transform_indices = @transform_3, window_bounds = array<i64: 16, 1>}, {transform_indices = @transform_4, window_bounds = array<i64: 1, 1, 128>}]} {
    %c0_i32 = arith.constant 0 : i32
    %0 = arith.cmpi eq, %arg1, %c0_i32 : i32
    %1 = arith.extui %0 : i1 to i32
    %c0_i32_0 = arith.constant 0 : i32
    %2 = arith.cmpi ne, %1, %c0_i32_0 : i32
    scf.if %2 {
      %cst_28 = arith.constant -1.000000e+30 : f32
      %45 = vector.broadcast %cst_28 : f32 to vector<16x1xf32>
      %c0_29 = arith.constant 0 : index
      %c0_30 = arith.constant 0 : index
      %46 = vector.load %arg7[%c0_29, %c0_30] : memref<16x1xf32, #tpu.memory_space<vmem>>, vector<16x1xf32>
      tpu.vector_store %arg7[%c0_29, %c0_30], %45 {strides = array<i32>} : memref<16x1xf32, #tpu.memory_space<vmem>>, vector<16x1xf32>,
      %cst_31 = arith.constant 0.000000e+00 : f32
      %47 = vector.broadcast %cst_31 : f32 to vector<16x1xf32>
      %c0_32 = arith.constant 0 : index
      %c0_33 = arith.constant 0 : index
      %48 = vector.load %arg8[%c0_32, %c0_33] : memref<16x1xf32, #tpu.memory_space<vmem>>, vector<16x1xf32>
      tpu.vector_store %arg8[%c0_32, %c0_33], %47 {strides = array<i32>} : memref<16x1xf32, #tpu.memory_space<vmem>>, vector<16x1xf32>,
      %cst_34 = arith.constant 0.000000e+00 : f32
      %49 = vector.broadcast %cst_34 : f32 to vector<16x1xf32>
      %c0_35 = arith.constant 0 : index
      %c0_36 = arith.constant 0 : index
      %50 = vector.load %arg9[%c0_35, %c0_36] : memref<16x1xf32, #tpu.memory_space<vmem>>, vector<16x1xf32>
      tpu.vector_store %arg9[%c0_35, %c0_36], %49 {strides = array<i32>} : memref<16x1xf32, #tpu.memory_space<vmem>>, vector<16x1xf32>,
    } else {
    }
    %c0 = arith.constant 0 : index
    %c0_1 = arith.constant 0 : index
    %3 = vector.load %arg2[%c0, %c0_1] : memref<16x32xbf16, #tpu.memory_space<vmem>>, vector<16x32xbf16>
    %c0_2 = arith.constant 0 : index
    %c0_3 = arith.constant 0 : index
    %4 = vector.load %arg3[%c0_2, %c0_3] : memref<32x128xbf16, #tpu.memory_space<vmem>>, vector<32x128xbf16>
    %cst = arith.constant dense<0.000000e+00> : vector<16x128xf32>
    %5 = tpu.matmul %3, %4, %cst {dimension_numbers = #tpu.dot_dimension_numbers<[1], [0], [0], [1], [0, 0, 1, 1], [], []>} : vector<16x32xbf16>, vector<32x128xbf16>, vector<16x128xf32> -> vector<16x128xf32>
    %c0_4 = arith.constant 0 : index
    %c0_5 = arith.constant 0 : index
    %6 = vector.load %arg4[%c0_4, %c0_5] : memref<1x128xf32, #tpu.memory_space<vmem>>, vector<1x128xf32>
    %7 = vector.broadcast %6 : vector<1x128xf32> to vector<16x128xf32>
    %8 = arith.addf %5, %7 : vector<16x128xf32>
    %c0_6 = arith.constant 0 : index
    %c0_7 = arith.constant 0 : index
    %9 = vector.load %arg5[%c0_6, %c0_7] : memref<16x1xi32, #tpu.memory_space<vmem>>, vector<16x1xi32>
    %c128_i32 = arith.constant 128 : i32
    %10 = arith.muli %arg1, %c128_i32 : i32
    %11 = tpu.iota {dimensions = array<i32: 1>} : vector<16x128xi32>
    %12 = vector.broadcast %10 : i32 to vector<16x128xi32>
    %13 = arith.addi %12, %11 : vector<16x128xi32>
    %cst_8 = arith.constant dense<0xFF800000> : vector<16xf32>
    %14 = vector.multi_reduction <maximumf>, %8, %cst_8 [1] : vector<16x128xf32> to vector<16xf32>
    %15 = vector.shape_cast %14 : vector<16xf32> to vector<16x1xf32>
    %c0_9 = arith.constant 0 : index
    %c0_10 = arith.constant 0 : index
    %16 = vector.load %arg7[%c0_9, %c0_10] : memref<16x1xf32, #tpu.memory_space<vmem>>, vector<16x1xf32>
    %17 = arith.maximumf %16, %15 : vector<16x1xf32>
    %c0_11 = arith.constant 0 : index
    %c0_12 = arith.constant 0 : index
    %18 = vector.load %arg7[%c0_11, %c0_12] : memref<16x1xf32, #tpu.memory_space<vmem>>, vector<16x1xf32>
    %19 = arith.subf %18, %17 : vector<16x1xf32>
    %20 = math.exp %19 : vector<16x1xf32>
    %21 = vector.broadcast %17 : vector<16x1xf32> to vector<16x128xf32>
    %22 = arith.subf %8, %21 : vector<16x128xf32>
    %23 = arith.truncf %22 : vector<16x128xf32> to vector<16x128xbf16>
    %24 = math.exp %23 : vector<16x128xbf16>
    %25 = arith.extf %24 : vector<16x128xbf16> to vector<16x128xf32>
    %cst_13 = arith.constant dense<0.000000e+00> : vector<16xf32>
    %26 = vector.multi_reduction <add>, %25, %cst_13 [1] : vector<16x128xf32> to vector<16xf32>
    %27 = vector.shape_cast %26 : vector<16xf32> to vector<16x1xf32>
    %c0_14 = arith.constant 0 : index
    %c0_15 = arith.constant 0 : index
    %28 = vector.load %arg8[%c0_14, %c0_15] : memref<16x1xf32, #tpu.memory_space<vmem>>, vector<16x1xf32>
    %29 = arith.mulf %20, %28 : vector<16x1xf32>
    %30 = arith.addf %29, %27 : vector<16x1xf32>
    %c0_16 = arith.constant 0 : index
    %c0_17 = arith.constant 0 : index
    %31 = vector.load %arg8[%c0_16, %c0_17] : memref<16x1xf32, #tpu.memory_space<vmem>>, vector<16x1xf32>
    tpu.vector_store %arg8[%c0_16, %c0_17], %30 {strides = array<i32>} : memref<16x1xf32, #tpu.memory_space<vmem>>, vector<16x1xf32>,
    %c0_18 = arith.constant 0 : index
    %c0_19 = arith.constant 0 : index
    %32 = vector.load %arg7[%c0_18, %c0_19] : memref<16x1xf32, #tpu.memory_space<vmem>>, vector<16x1xf32>
    tpu.vector_store %arg7[%c0_18, %c0_19], %17 {strides = array<i32>} : memref<16x1xf32, #tpu.memory_space<vmem>>, vector<16x1xf32>,
    %c0_20 = arith.constant 0 : index
    %c0_21 = arith.constant 0 : index
    %33 = vector.load %arg9[%c0_20, %c0_21] : memref<16x1xf32, #tpu.memory_space<vmem>>, vector<16x1xf32>
    %34 = vector.broadcast %9 : vector<16x1xi32> to vector<16x128xi32>
    %35 = arith.cmpi eq, %13, %34 : vector<16x128xi32>
    %cst_22 = arith.constant 0.000000e+00 : f32
    %36 = vector.broadcast %cst_22 : f32 to vector<16x128xf32>
    %37 = arith.select %35, %8, %36 : vector<16x128xi1>, vector<16x128xf32>
    %cst_23 = arith.constant dense<0.000000e+00> : vector<16xf32>
    %38 = vector.multi_reduction <add>, %37, %cst_23 [1] : vector<16x128xf32> to vector<16xf32>
    %39 = vector.shape_cast %38 : vector<16xf32> to vector<16x1xf32>
    %40 = arith.addf %33, %39 : vector<16x1xf32>
    %c0_24 = arith.constant 0 : index
    %c0_25 = arith.constant 0 : index
    %41 = vector.load %arg9[%c0_24, %c0_25] : memref<16x1xf32, #tpu.memory_space<vmem>>, vector<16x1xf32>
    tpu.vector_store %arg9[%c0_24, %c0_25], %40 {strides = array<i32>} : memref<16x1xf32, #tpu.memory_space<vmem>>, vector<16x1xf32>,
    %c0_i32_26 = arith.constant 0 : i32
    %42 = arith.cmpi eq, %arg1, %c0_i32_26 : i32
    %43 = arith.extui %42 : i1 to i32
    %c0_i32_27 = arith.constant 0 : i32
    %44 = arith.cmpi ne, %43, %c0_i32_27 : i32
    scf.if %44 {
      %c-100_i32 = arith.constant -100 : i32
      %45 = vector.broadcast %c-100_i32 : i32 to vector<16x1xi32>
      %46 = arith.cmpi ne, %9, %45 : vector<16x1xi32>
      %47 = arith.extui %46 : vector<16x1xi1> to vector<16x1xi32>
      %48 = arith.sitofp %47 : vector<16x1xi32> to vector<16x1xf32>
      %c0_28 = arith.constant 0 : index
      %c0_29 = arith.constant 0 : index
      %49 = vector.load %arg7[%c0_28, %c0_29] : memref<16x1xf32, #tpu.memory_space<vmem>>, vector<16x1xf32>
      %c0_30 = arith.constant 0 : index
      %c0_31 = arith.constant 0 : index
      %50 = vector.load %arg8[%c0_30, %c0_31] : memref<16x1xf32, #tpu.memory_space<vmem>>, vector<16x1xf32>
      %51 = math.log %50 : vector<16x1xf32>
      %52 = arith.addf %49, %51 : vector<16x1xf32>
      %c0_32 = arith.constant 0 : index
      %c0_33 = arith.constant 0 : index
      %53 = vector.load %arg9[%c0_32, %c0_33] : memref<16x1xf32, #tpu.memory_space<vmem>>, vector<16x1xf32>
      %54 = arith.subf %52, %53 : vector<16x1xf32>
      %55 = arith.mulf %54, %48 : vector<16x1xf32>
      %56 = tpu.iota {dimensions = array<i32: 2>} : vector<1x1x128xi32>
      %c0_i32_34 = arith.constant 0 : i32
      %57 = vector.broadcast %c0_i32_34 : i32 to vector<1x1x128xi32>
      %58 = arith.cmpi eq, %56, %57 : vector<1x1x128xi32>
      %59 = vector.shape_cast %55 : vector<16x1xf32> to vector<1x16x1xf32>
      %cst_35 = arith.constant dense<0.000000e+00> : vector<1xf32>
      %60 = vector.multi_reduction <add>, %59, %cst_35 [1, 2] : vector<1x16x1xf32> to vector<1xf32>
      %61 = vector.shape_cast %60 : vector<1xf32> to vector<1x1x1xf32>
      %62 = vector.extract %61[0, 0, 0] : f32 from vector<1x1x1xf32>
      %cst_36 = arith.constant 0.000000e+00 : f32
      %63 = vector.broadcast %62 : f32 to vector<1x1x128xf32>
      %64 = vector.broadcast %cst_36 : f32 to vector<1x1x128xf32>
      %65 = arith.select %58, %63, %64 : vector<1x1x128xi1>, vector<1x1x128xf32>
      %c1_i32 = arith.constant 1 : i32
      %66 = vector.broadcast %c1_i32 : i32 to vector<1x1x128xi32>
      %67 = arith.cmpi eq, %56, %66 : vector<1x1x128xi32>
      %68 = vector.shape_cast %48 : vector<16x1xf32> to vector<1x16x1xf32>
      %cst_37 = arith.constant dense<0.000000e+00> : vector<1xf32>
      %69 = vector.multi_reduction <add>, %68, %cst_37 [1, 2] : vector<1x16x1xf32> to vector<1xf32>
      %70 = vector.shape_cast %69 : vector<1xf32> to vector<1x1x1xf32>
      %71 = vector.extract %70[0, 0, 0] : f32 from vector<1x1x1xf32>
      %cst_38 = arith.constant 0.000000e+00 : f32
      %72 = vector.broadcast %71 : f32 to vector<1x1x128xf32>
      %73 = vector.broadcast %cst_38 : f32 to vector<1x1x128xf32>
      %74 = arith.select %67, %72, %73 : vector<1x1x128xi1>, vector<1x1x128xf32>
      %75 = arith.addf %65, %74 : vector<1x1x128xf32>
      %c0_39 = arith.constant 0 : index
      %c0_40 = arith.constant 0 : index
      %c0_41 = arith.constant 0 : index
      %76 = vector.load %arg6[%c0_39, %c0_40, %c0_41] : memref<1x1x128xf32, #tpu.memory_space<vmem>>, vector<1x1x128xf32>
      tpu.vector_store %arg6[%c0_39, %c0_40, %c0_41], %75 {strides = array<i32>} : memref<1x1x128xf32, #tpu.memory_space<vmem>>, vector<1x1x128xf32>,
    } else {
    }
    return
  }
  func.func @transform_0(%arg0: i32, %arg1: i32) -> (i32, i32) {
    %c0_i32 = arith.constant 0 : i32
    %c0_i32_0 = arith.constant 0 : i32
    return %arg0, %c0_i32 : i32, i32
  }
  func.func @transform_1(%arg0: i32, %arg1: i32) -> (i32, i32) {
    %c0_i32 = arith.constant 0 : i32
    %c0_i32_0 = arith.constant 0 : i32
    return %c0_i32, %arg1 : i32, i32
  }
  func.func @transform_2(%arg0: i32, %arg1: i32) -> (i32, i32) {
    %c0_i32 = arith.constant 0 : i32
    %c0_i32_0 = arith.constant 0 : i32
    return %c0_i32, %arg1 : i32, i32
  }
  func.func @transform_3(%arg0: i32, %arg1: i32) -> (i32, i32) {
    %c0_i32 = arith.constant 0 : i32
    %c0_i32_0 = arith.constant 0 : i32
    return %arg0, %c0_i32 : i32, i32
  }
  func.func @transform_4(%arg0: i32, %arg1: i32) -> (i32, i32, i32) {
    %c0_i32 = arith.constant 0 : i32
    %c0_i32_0 = arith.constant 0 : i32
    %c0_i32_1 = arith.constant 0 : i32
    return %arg0, %c0_i32, %c0_i32_0 : i32, i32, i32
  }
}

</mosaic_0001>

<bundles_post_ra>
// kernel: tpu_custom_call.1
= control target key start
LH: loop header
LB: loop body
LE: loop exit
PB: predicated region body
PF: predicated region fallthrough
CT: control target
= control target key end

     0   :  { %9 = vsyncpa [#allocation6], 0  ;;  %s469_s0 = inlined_call_operand.hbm [shape: bf16[16,32], index: 0, kind: input, shape index: {}]   ;;  %s470_s1 = inlined_call_operand.vmem [shape: bf16[32,128], index: 1, kind: input, shape index: {}]   ;;  %s471_s2 = inlined_call_operand.vmem [shape: f32[1,128], index: 2, kind: input, shape index: {}]   ;;  %s472_s3 = inlined_call_operand.vmem [shape: s32[16,1], index: 3, kind: input, shape index: {}]   ;;  %s473_s4 = inlined_call_operand.hbm [shape: f32[1,1,128], index: 4, kind: output, shape index: {}]  }
   0x1   :  { %10 = vsyncpa [#allocation7], 0  ;;  %s358_s15 = smov [#allocation5]   ;;  %s310_s19 = scalar_lea.hbm %s469_s0, 128 }
   0x2   :  { %s16_s16 = sshll.u32 %s358_s15, 4  ;;  %p311_p0 = scmp.ne.s32.totalorder %s469_s0, %s310_s19  ;;  %s17_s16 = int_to_ptr.vmem [resolvable:$true] %s16_s16 }
   0x3   :  { %p314_p1 = scmp.lt.u32.totalorder %s310_s19, %s469_s0 }
   0x5   :  { %p316_p2 = pnand %p314_p1, %p311_p0 }
   0x7   :  { %319 = shalt.err (!%p316_p2)
}
   0x8   :  { %s320_s24 = scalar_lea.vmem %s17_s16, 128  ;;  %p325_p4 = scmp.lt.s32.totalorder %s17_s16, %s17_s16 }
   0x9   :  { %p321_p3 = scmp.ne.s32.totalorder %s17_s16, %s320_s24  ;;  %p326_p5 = scmp.lt.s32.totalorder %s320_s24, %s320_s24 }
   0xb   :  { %p327_p6 = por %p326_p5, %p325_p4 }
   0xd   :  { %p328_p7 = pnand %p327_p6, %p321_p3 }
   0xf   :  { %331 = shalt.err (!%p328_p7)
}
  0x10   :  { %s359_s25 = smov 64   ;;  %s360_s26 = smov 4  }
  0x11   :  { %22 = dma.hbm_to_vmem [thread:$0]  %s469_s0, 128, %s17_s16, [#allocation6], %s359_s25, %s359_s25, %s360_s26  }
  0x12   :  { %354 = dma.done.wait [#allocation6], 128  }
  0x13   :  { %355 = vsyncadd [#allocation6], 4294967168  ;;  %v361_v0 = vmov 0.0   ;;  %vm362_vm0 = vmmov 0   ;;  %v297_v1 = vld [vmem:[%s470_s1] sm:$0xff]   ;;  %v298_v2 = vld [vmem:[%s470_s1 + $0x8] sm:$0xff]   ;;  %v122_v21 = vlaneseq }
  0x14   :  { %275 = vmatprep.subr.bf16.mxu0 %v361_v0  ;;  %279 = vmatprep.mubr.msk.bf16.mxu0 %vm362_vm0, %v361_v0  ;;  %v299_v3 = vld [vmem:[#allocation5] sm:$0xff]   ;;  %vm74_vm1 = vcmask 261120   ;;  %v363_v4 = vmov 0   ;;  %vm37_vm2 = vcmask 7168   ;;  %v364_v5 = vmov -1e+30  }
  0x15   :  { %276 = vmatpush3.bf16.msra.mxu0 %v297_v1  ;;  %296 = vset.pattern.permute.xlu0 %v363_v4  ;;  %38 = vst.msk [vmem:[#allocation2] sm:$0xff] %vm37_vm2, %v364_v5  ;;  %39 = vst.msk [vmem:[#allocation2 + $0x8] sm:$0xff] %vm37_vm2, %v364_v5  ;;  %v265_v6 = vld [vmem:[%s471_s2] ss:$0 sm:$0xff]  ;;  %v436_v23 = vld [vmem:[%s472_s3 + $0x8] sm:$0xff]  ;;  %v438_v24 = vand.u32 127, %v122_v21 }
  0x16   :  { %277 = vmatprep.subr.bf16.mxu0 %v361_v0  ;;  %295 = vset.pattern.permute.xlu1 %v363_v4  ;;  %40 = vst.msk [vmem:[#allocation3] sm:$0xff] %vm37_vm2, %v361_v0  ;;  %41 = vst.msk [vmem:[#allocation3 + $0x8] sm:$0xff] %vm37_vm2, %v361_v0  ;;  %v428_v13 = vld [vmem:[%s472_s3] sm:$0xff]  ;;  %vm197_vm6 = vcmp.ne.s32.totalorder %v436_v23, 4294967196  ;;  %s365_s11 = smov [#allocation8]  }
  0x17   :  { %42 = vst.msk [vmem:[#allocation4] sm:$0xff] %vm37_vm2, %v361_v0  ;;  %43 = vst.msk [vmem:[#allocation4 + $0x8] sm:$0xff] %vm37_vm2, %v361_v0  ;;  %vm196_vm5 = vcmp.ne.s32.totalorder %v428_v13, 4294967196  ;;  %vm218_vm7 = vcmp.eq.s32.totalorder %v438_v24, 0  ;;  %vm233_vm8 = vcmp.eq.s32.totalorder %v438_v24, 1  ;;  %s256_s12 = sshll.u32 %s365_s11, 4  ;;  %s257_s12 = int_to_ptr.vmem [resolvable:$true] %s256_s12 }
  0x18   :  { %s332_s13 = scalar_lea.vmem %s257_s12, 16  ;;  %s336_s14 = scalar_lea.vmem %s257_s12, 32 }
  0x19   :  { %278 = vmatpush3.bf16.msra.mxu0 %v298_v2  ;;  %p333_p8 = scmp.ne.s32.totalorder %s257_s12, %s332_s13  ;;  %p337_p9 = scmp.lt.s32.totalorder %s257_s12, %s257_s12 }
  0x1a   :  { %p338_p10 = scmp.lt.s32.totalorder %s336_s14, %s332_s13 }
  0x1c   :  { %280 = vmatmul.mubr.msk.bf16.vlgmr.msra.gmra.mrb[0].mxu0 %vm74_vm1, %v299_v3  ;;  %v130_v14 = vld [vmem:[#allocation2] sm:$0xff]  ;;  %v131_v17 = vld [vmem:[#allocation2 + $0x8] sm:$0xff]  ;;  %v270_v3 = vsel %vm196_vm5, 1.0, %v361_v0  ;;  %p339_p11 = por %p338_p10, %p337_p9 }
  0x1d   :  { %v162_v44 = vld [vmem:[#allocation3] sm:$0xff]  ;;  %v163_v48 = vld [vmem:[#allocation3 + $0x8] sm:$0xff] }
  0x1e   :  { %v173_v35 = vld [vmem:[#allocation4] sm:$0xff]  ;;  %v174_v53 = vld [vmem:[#allocation4 + $0x8] sm:$0xff]  ;;  %p340_p12 = pnand %p339_p11, %p333_p8 }
  0xef   :  { %v112_v7 = vpop.f32.mrb[0].mxu0 }
  0xf0   :  { %v113_v8 = vadd.f32 %v265_v6, %v112_v7  ;;  %v281_v9 = vpop.f32.mrb[1].mxu0 }
  0xf1   :  { %v115_v10 = vpop.f32.mrb[2].mxu0 }
  0xf2   :  { %126 = vmax.xlane.f32.xlu0 %v113_v8  ;;  %v282_v11 = vpop.f32.mrb[3].mxu0  ;;  %v116_v12 = vadd.f32 %v265_v6, %v115_v10  ;;  %v271_v6 = vsel %vm197_vm6, 1.0, %v361_v0 }
  0xf6   :  { %128 = vmax.xlane.f32.xlu0 %v116_v12 }
 0x10c   :  { %176 = vperm.xlu0 %296, %v428_v13   ;;  %v234_v13 = vsel %vm37_vm2, %v270_v3, 0.0 }
 0x17f   :  { %v127_v15 = vpop.xlane.xlu0 %126 }
 0x180   :  { %v132_v16 = vmax.f32 %v130_v14, %v127_v15 }
 0x182   :  { %v134_v18 = vsub.f32 %v130_v14, %v132_v16  ;;  %171 = vst.msk [vmem:[#allocation2] sm:$0xff] %vm37_vm2, %v132_v16  ;;  %142 = vperm.xlu1 %295, %v132_v16   ;;  %v235_v14 = vsel %vm37_vm2, %v271_v6, 0.0 }
 0x183   :  { %v129_v19 = vpop.xlane.xlu0 %128  ;;  %v236_v16 = vadd.f32 %v235_v14, %v234_v13 }
 0x184   :  { %v133_v20 = vmax.f32 %v131_v17, %v129_v19  ;;  %v136_v41 = vmul.f32 1.442695, %v134_v18 }
 0x186   :  { %v135_v22 = vsub.f32 %v131_v17, %v133_v20  ;;  %172 = vst.msk [vmem:[#allocation2 + $0x8] sm:$0xff] %vm37_vm2, %v133_v20  ;;  %147 = vperm.xlu1 %295, %v133_v20  }
 0x188   :  { %v138_v42 = vmul.f32 1.442695, %v135_v22 }
 0x189   :  { %v202_v60 = vld [vmem:[#allocation2] sm:$0xff] }
 0x18a   :  { %179 = vperm.xlu1 %295, %v436_v23  }
 0x18b   :  { %v177_v25 = vpop.permute.xlu0 %176 }
 0x18c   :  { %vm181_vm3 = vcmp.eq.s32.totalorder %v438_v24, %v177_v25 }
 0x18d   :  { %v183_v26 = vsel %vm181_vm3, %v113_v8, 0.0  ;;  %v203_v4 = vld [vmem:[#allocation2 + $0x8] sm:$0xff] }
 0x18e   :  { %185 = vadd.xlane.f32.xlu0 %v183_v26 }
 0x201   :  { %v143_v27 = vpop.permute.xlu1 %142 }
 0x202   :  { %v150_v29 = vsub.f32 %v113_v8, %v143_v27 }
 0x205   :  { %v148_v28 = vpop.permute.xlu1 %147 }
 0x206   :  { %v151_v30 = vsub.f32 %v116_v12, %v148_v28 }
 0x208   :  { %v152_v31 = vpack.c.bf16 %v151_v30, %v150_v29 }
 0x209   :  { %v180_v36 = vpop.permute.xlu1 %179 }
 0x20a   :  { %v154_v32 = vmul.bf16 1069105081, %v152_v31  ;;  %vm182_vm4 = vcmp.eq.s32.totalorder %v438_v24, %v180_v36 }
 0x20b   :  { %v184_v40 = vsel %vm182_vm4, %v116_v12, 0.0 }
 0x20c   :  { %300 = vpow.bf16 %v154_v32 }
 0x20d   :  { %302 = vpow2.f32 %v136_v41 }
 0x20e   :  { %304 = vpow2.f32 %v138_v42 }
 0x217   :  { %v301_v33 = vpop.eup %300 }
 0x218   :  { %v156_v34 = vunpack.c.l.bf16 %v301_v33  ;;  %v157_v39 = vunpack.c.h.bf16 %v301_v33  ;;  %v303_v43 = vpop.eup %302 }
 0x219   :  { %v164_v45 = vmul.f32 %v303_v43, %v162_v44  ;;  %v305_v46 = vpop.eup %304 }
 0x21a   :  { %158 = vadd.xlane.f32.xlu1 %v156_v34  ;;  %v165_v50 = vmul.f32 %v305_v46, %v163_v48 }
 0x21b   :  { %v186_v37 = vpop.xlane.xlu0 %185 }
 0x21c   :  { %v189_v38 = vadd.f32 %v186_v37, %v173_v35 }
 0x21e   :  { %191 = vst.msk [vmem:[#allocation4] sm:$0xff] %vm37_vm2, %v189_v38  ;;  %160 = vadd.xlane.f32.xlu1 %v157_v39 }
 0x222   :  { %187 = vadd.xlane.f32.xlu1 %v184_v40 }
 0x225   :  { %v212_v63 = vld [vmem:[#allocation4] sm:$0xff] }
 0x2a7   :  { %v159_v47 = vpop.xlane.xlu1 %158 }
 0x2a8   :  { %v166_v49 = vadd.f32 %v164_v45, %v159_v47 }
 0x2aa   :  { %169 = vst.msk [vmem:[#allocation3] sm:$0xff] %vm37_vm2, %v166_v49 }
 0x2ab   :  { %v161_v51 = vpop.xlane.xlu1 %160 }
 0x2ac   :  { %v167_v52 = vadd.f32 %v165_v50, %v161_v51 }
 0x2ae   :  { %170 = vst.msk [vmem:[#allocation3 + $0x8] sm:$0xff] %vm37_vm2, %v167_v52 }
 0x2af   :  { %v188_v54 = vpop.xlane.xlu1 %187 }
 0x2b0   :  { %v190_v55 = vadd.f32 %v188_v54, %v174_v53 }
 0x2b1   :  { %v204_v56 = vld [vmem:[#allocation3] sm:$0xff] }
 0x2b2   :  { %192 = vst.msk [vmem:[#allocation4 + $0x8] sm:$0xff] %vm37_vm2, %v190_v55  ;;  %306 = vlog2.f32 %v204_v56 }
 0x2b5   :  { %v205_v57 = vld [vmem:[#allocation3 + $0x8] sm:$0xff] }
 0x2b6   :  { %308 = vlog2.f32 %v205_v57 }
 0x2b9   :  { %v213_v7 = vld [vmem:[#allocation4 + $0x8] sm:$0xff] }
 0x2bc   :  { %v307_v58 = vpop.eup %306 }
 0x2bd   :  { %v207_v59 = vmul.f32 0.6931472, %v307_v58 }
 0x2bf   :  { %v210_v61 = vadd.f32 %v207_v59, %v202_v60 }
 0x2c0   :  { %v309_v62 = vpop.eup %308 }
 0x2c1   :  { %v209_v1 = vmul.f32 0.6931472, %v309_v62  ;;  %v214_v2 = vsub.f32 %v210_v61, %v212_v63 }
 0x2c3   :  { %v211_v5 = vadd.f32 %v209_v1, %v203_v4  ;;  %v216_v9 = vmul.f32 %v270_v3, %v214_v2 }
 0x2c5   :  { %v215_v8 = vsub.f32 %v211_v5, %v213_v7  ;;  %v219_v11 = vsel %vm37_vm2, %v216_v9, 0.0 }
 0x2c7   :  { %v217_v10 = vmul.f32 %v271_v6, %v215_v8 }
 0x2c9   :  { %v220_v12 = vsel %vm37_vm2, %v217_v10, 0.0 }
 0x2ca   :  { %v221_v15 = vadd.f32 %v220_v12, %v219_v11 }
 0x2cc   :  { %222 = vadd.xlane.f32.xlu1 %v221_v15 }
 0x2d0   :  { %237 = vadd.xlane.f32.xlu1 %v236_v16 }
 0x359   :  { %v223_v17 = vpop.xlane.xlu1 %222 }
 0x35a   :  { %v224_v18 = vrot.slane %v223_v17, 4 }
 0x35c   :  { %v225_v19 = vadd.f32 %v224_v18, %v223_v17 }
 0x35d   :  { %v238_v0 = vpop.xlane.xlu1 %237 }
 0x35e   :  { %v226_v20 = vrot.slane %v225_v19, 2  ;;  %v239_v21 = vrot.slane %v238_v0, 4 }
 0x360   :  { %v240_v22 = vadd.f32 %v239_v21, %v238_v0  ;;  %v227_v23 = vadd.f32 %v226_v20, %v225_v19 }
 0x362   :  { %v241_v25 = vrot.slane %v240_v22, 2  ;;  %v228_v26 = vrot.slane %v227_v23, 1 }
 0x364   :  { %v242_v27 = vadd.f32 %v241_v25, %v240_v22  ;;  %v229_v28 = vadd.f32 %v228_v26, %v227_v23 }
 0x366   :  { %283 = vpush %v229_v28  ;;  %v243_v29 = vrot.slane %v242_v27, 1 }
 0x368   :  { %v244_v30 = vadd.f32 %v243_v29, %v242_v27 }
 0x36a   :  { %285 = vpush %v244_v30 }
 0x397   :  { %s284_s3 = spop %283 }
 0x398   :  { %v231_v31 = vstv %s284_s3 }
 0x399   :  { %v232_v33 = vsel %vm218_vm7, %v231_v31, 0.0 }
 0x39b   :  { %s286_s10 = spop %285 }
 0x39c   :  { %v246_v32 = vstv %s286_s10 }
 0x39d   :  { %v247_v34 = vsel %vm233_vm8, %v246_v32, 0.0 }
 0x39e   :  { %v248_v35 = vadd.f32 %v247_v34, %v232_v33 }
 0x3a0   :  { %249 = vst [vmem:[#allocation8] sm:$0x1] %v248_v35 }
 0x3a1   :  { %343 = shalt.err (!%p340_p12)
}
 0x3a2   :  { %s344_s17 = scalar_lea.hbm %s473_s4, 16 }
 0x3a3   :  { %p345_p13 = scmp.ne.s32.totalorder %s473_s4, %s344_s17  ;;  %p348_p0 = scmp.lt.u32.totalorder %s344_s17, %s473_s4 }
 0x3a5   :  { %p350_p1 = pnand %p348_p0, %p345_p13 }
 0x3a7   :  { %353 = shalt.err (!%p350_p1)
}
 0x3a8   :  { %259 = dma.vmem_to_hbm [thread:$0]  %s257_s12, 16, %s473_s4, [#allocation7]  }
 0x3a9   :  { %356 = dma.done.wait [#allocation7], 16  }
 0x3aa   :  { %357 = vsyncadd [#allocation7], 4294967280 }
 0x3ab   :  { %263 = vsyncpa [#allocation6], 1 }
 0x3ac   :  { %264 = vsyncpa [#allocation7], 1 }

</bundles_post_ra>
